<compile_context>
chip_gen: v5e
topology: v5e:2x2
jax: 0.10.0
libtpu: 0.0.40
codegen_flags: <defaults>
</compile_context>

<pallas_src>
import jax
import jax.numpy as jnp
from jax.experimental import pallas as pl
from jax.experimental.pallas import tpu as pltpu

# ---------------- model hyper-parameters (small, consistent with the module) ----
B = 2                      # batch
NUM_TOKENS = 8             # tokens / tabular features
APOE = NUM_TOKENS - 3      # tokens with per-feature learned embeddings
N_LIN = NUM_TOKENS - APOE  # 3 tokens share the Linear(1, dim) embedding
DIM = 128                  # feature dim, lane-dense (multiple of 128)


def embeddings_kernel(x_ref, scale_ref, bias_ref, full_ref, cls_ref):
    """Whole Embeddings.forward for the full batch in one grid step.

    x_ref     : (B, T, 1)   feature scalar values (lane-broadcast friendly)
    scale_ref : (T, DIM)    precomputed per-token scale slab
    bias_ref  : (T, DIM)    precomputed per-token bias slab
    full_ref  : (B, T, DIM) token embeddings (sublane-aligned store)
    cls_ref   : (B, 1, DIM) mean-pooled cls token
    """
    xv = x_ref[...].astype(jnp.float32)          # (B, T, 1)
    scale = scale_ref[...].astype(jnp.float32)   # (T, DIM)
    bias = bias_ref[...].astype(jnp.float32)     # (T, DIM)

    # One fused broadcast FMA: size-1 lane axis of xv broadcasts over DIM,
    # leading axis of the slabs broadcasts over the batch.
    full = xv * scale[None, :, :] + bias[None, :, :]            # (B, T, DIM)

    # cls token = AdaptiveAvgPool2d((1, None)) = mean over the token axis.
    cls = jnp.mean(full, axis=1, keepdims=True)                 # (B, 1, DIM)

    # Lane-dense, sublane-aligned, unmasked stores.
    full_ref[...] = full.astype(full_ref.dtype)
    cls_ref[...] = cls.astype(cls_ref.dtype)


def build_param_slabs(e1, w2, b2):
    """Fold embeds1 / Linear(1, dim) into per-token scale & bias slabs.

    Done ONCE at parameter-setup time (not in the kernel hot path).
      scale[t] = embeds1[t]            for t <  APOE
      scale[t] = linear_weight         for t >= APOE
      bias[t]  = 0                     for t <  APOE
      bias[t]  = linear_bias           for t >= APOE
    """
    scale = jnp.concatenate(
        [e1, jnp.broadcast_to(w2, (N_LIN, DIM))], axis=0)        # (T, DIM)
    bias = jnp.concatenate(
        [jnp.zeros((APOE, DIM), e1.dtype),
         jnp.broadcast_to(b2, (N_LIN, DIM))], axis=0)            # (T, DIM)
    return scale, bias


def embeddings_forward(x, scale, bias):
    """x: (B, NUM_TOKENS, 1), scale/bias: (NUM_TOKENS, DIM)
       -> (B, NUM_TOKENS + 1, DIM)."""

    def full_spec(shape):
        ndim = len(shape)
        return pl.BlockSpec(shape, lambda i, _n=ndim: (0,) * _n)

    grid_spec = pltpu.PrefetchScalarGridSpec(
        num_scalar_prefetch=0,
        grid=(1,),                                 # single step: whole batch at once
        in_specs=[
            full_spec(x.shape),                    # (B, T, 1) values
            full_spec(scale.shape),                # (T, DIM) scale slab
            full_spec(bias.shape),                 # (T, DIM) bias slab
        ],
        out_specs=[
            full_spec((B, NUM_TOKENS, DIM)),       # full token embeddings
            full_spec((B, 1, DIM)),                # cls token
        ],
    )

    full, cls = pl.pallas_call(
        embeddings_kernel,
        out_shape=(
            jax.ShapeDtypeStruct((B, NUM_TOKENS, DIM), x.dtype),
            jax.ShapeDtypeStruct((B, 1, DIM), x.dtype),
        ),
        grid_spec=grid_spec,
        compiler_params=pltpu.CompilerParams(
            dimension_semantics=("arbitrary",)),
    )(x, scale, bias)

    # Module-level [cls, x] concat is done here where XLA fuses it with the
    # consumer; the kernel keeps its stores sublane-aligned and unmasked.
    return jnp.concatenate([cls, full], axis=1)    # (B, T + 1, DIM)


def reference_forward(x, e1, w2, b2):
    """Plain-JAX reference mirroring the PyTorch Embeddings.forward."""
    x1 = x[:, :APOE, :] * e1[None, :, :]                       # (B, APOE, DIM)
    x2 = x[:, APOE:, :] * w2[None, :, :] + b2[None, :, :]      # (B, N_LIN, DIM)
    full = jnp.concatenate([x1, x2], axis=1)                   # (B, T, DIM)
    cls = jnp.mean(full, axis=1, keepdims=True)                # (B, 1, DIM)
    return jnp.concatenate([cls, full], axis=1)                # (B, T + 1, DIM)


if __name__ == "__main__":
    key = jax.random.PRNGKey(0)
    kx, k1, k2, k3 = jax.random.split(key, 4)

    # x[:, t, 0] is the scalar value of feature t (last dim 1, as Linear(1, dim) expects).
    x = jax.random.normal(kx, (B, NUM_TOKENS, 1), jnp.float32)
    e1 = jax.random.normal(k1, (APOE, DIM), jnp.float32)            # nn.Parameter(randn)
    w2 = jax.random.normal(k2, (1, DIM), jnp.float32) * 0.5         # Linear weight^T (1, dim)
    b2 = jax.random.normal(k3, (1, DIM), jnp.float32) * 0.02        # Linear bias

    # Parameter preprocessing: done once, outside the kernel hot path.
    scale, bias = build_param_slabs(e1, w2, b2)

    out = embeddings_forward(x, scale, bias)
    out = jax.block_until_ready(out)

    ref = reference_forward(x, e1, w2, b2)
    assert out.shape == (B, NUM_TOKENS + 1, DIM)
    assert jnp.allclose(out, ref, atol=1e-4, rtol=1e-4), (
        f"max abs diff {jnp.max(jnp.abs(out - ref))}")
    print("KERNEL_OK")
</pallas_src>

<mosaic_0001>
module attributes {stable_mosaic.version = 11 : i64} {
  func.func @embeddings_kernel(%arg0: i32, %arg1: memref<2x8x1xf32, #tpu.memory_space<vmem>>, %arg2: memref<8x128xf32, #tpu.memory_space<vmem>>, %arg3: memref<8x128xf32, #tpu.memory_space<vmem>>, %arg4: memref<2x8x128xf32, #tpu.memory_space<vmem>>, %arg5: memref<2x1x128xf32, #tpu.memory_space<vmem>>) attributes {dimension_semantics = [#tpu.dimension_semantics<arbitrary>], iteration_bounds = array<i64: 1>, scalar_prefetch = 0 : i64, scratch_operands = 0 : i64, tpu.core_type = #tpu.core_type<tc>, window_params = [{pipeline_mode = #tpu.pipeline_mode<synchronous>, transform_indices = @transform_0, window_bounds = array<i64: 2, 8, 1>}, {pipeline_mode = #tpu.pipeline_mode<synchronous>, transform_indices = @transform_1, window_bounds = array<i64: 8, 128>}, {pipeline_mode = #tpu.pipeline_mode<synchronous>, transform_indices = @transform_2, window_bounds = array<i64: 8, 128>}, {pipeline_mode = #tpu.pipeline_mode<synchronous>, transform_indices = @transform_3, window_bounds = array<i64: 2, 8, 128>}, {pipeline_mode = #tpu.pipeline_mode<synchronous>, transform_indices = @transform_4, window_bounds = array<i64: 2, 1, 128>}]} {
    %c0 = arith.constant 0 : index
    %c0_0 = arith.constant 0 : index
    %c0_1 = arith.constant 0 : index
    %0 = vector.load %arg1[%c0, %c0_0, %c0_1] : memref<2x8x1xf32, #tpu.memory_space<vmem>>, vector<2x8x1xf32>
    %c0_2 = arith.constant 0 : index
    %c0_3 = arith.constant 0 : index
    %1 = vector.load %arg2[%c0_2, %c0_3] : memref<8x128xf32, #tpu.memory_space<vmem>>, vector<8x128xf32>
    %c0_4 = arith.constant 0 : index
    %c0_5 = arith.constant 0 : index
    %2 = vector.load %arg3[%c0_4, %c0_5] : memref<8x128xf32, #tpu.memory_space<vmem>>, vector<8x128xf32>
    %3 = vector.shape_cast %1 : vector<8x128xf32> to vector<1x8x128xf32>
    %4 = vector.broadcast %0 : vector<2x8x1xf32> to vector<2x8x128xf32>
    %5 = vector.broadcast %3 : vector<1x8x128xf32> to vector<2x8x128xf32>
    %6 = arith.mulf %4, %5 : vector<2x8x128xf32>
    %7 = vector.shape_cast %2 : vector<8x128xf32> to vector<1x8x128xf32>
    %8 = vector.broadcast %7 : vector<1x8x128xf32> to vector<2x8x128xf32>
    %9 = arith.addf %6, %8 : vector<2x8x128xf32>
    %cst = arith.constant dense<0.000000e+00> : vector<2x128xf32>
    %10 = vector.multi_reduction <add>, %9, %cst [1] : vector<2x8x128xf32> to vector<2x128xf32>
    %11 = vector.shape_cast %10 : vector<2x128xf32> to vector<2x1x128xf32>
    %cst_6 = arith.constant 8.000000e+00 : f32
    %12 = vector.broadcast %cst_6 : f32 to vector<2x1x128xf32>
    %13 = arith.divf %11, %12 : vector<2x1x128xf32>
    %c0_7 = arith.constant 0 : index
    %c0_8 = arith.constant 0 : index
    %c0_9 = arith.constant 0 : index
    %14 = vector.load %arg4[%c0_7, %c0_8, %c0_9] : memref<2x8x128xf32, #tpu.memory_space<vmem>>, vector<2x8x128xf32>
    tpu.vector_store %arg4[%c0_7, %c0_8, %c0_9], %9 {strides = array<i32>} : memref<2x8x128xf32, #tpu.memory_space<vmem>>, vector<2x8x128xf32>,
    %c0_10 = arith.constant 0 : index
    %c0_11 = arith.constant 0 : index
    %c0_12 = arith.constant 0 : index
    %15 = vector.load %arg5[%c0_10, %c0_11, %c0_12] : memref<2x1x128xf32, #tpu.memory_space<vmem>>, vector<2x1x128xf32>
    tpu.vector_store %arg5[%c0_10, %c0_11, %c0_12], %13 {strides = array<i32>} : memref<2x1x128xf32, #tpu.memory_space<vmem>>, vector<2x1x128xf32>,
    return
  }
  func.func @transform_0(%arg0: i32) -> (i32, i32, i32) {
    %c0_i32 = arith.constant 0 : i32
    %c0_i32_0 = arith.constant 0 : i32
    %c0_i32_1 = arith.constant 0 : i32
    %c0_i32_2 = arith.constant 0 : i32
    return %c0_i32, %c0_i32_0, %c0_i32_1 : i32, i32, i32
  }
  func.func @transform_1(%arg0: i32) -> (i32, i32) {
    %c0_i32 = arith.constant 0 : i32
    %c0_i32_0 = arith.constant 0 : i32
    %c0_i32_1 = arith.constant 0 : i32
    return %c0_i32, %c0_i32_0 : i32, i32
  }
  func.func @transform_2(%arg0: i32) -> (i32, i32) {
    %c0_i32 = arith.constant 0 : i32
    %c0_i32_0 = arith.constant 0 : i32
    %c0_i32_1 = arith.constant 0 : i32
    return %c0_i32, %c0_i32_0 : i32, i32
  }
  func.func @transform_3(%arg0: i32) -> (i32, i32, i32) {
    %c0_i32 = arith.constant 0 : i32
    %c0_i32_0 = arith.constant 0 : i32
    %c0_i32_1 = arith.constant 0 : i32
    %c0_i32_2 = arith.constant 0 : i32
    return %c0_i32, %c0_i32_0, %c0_i32_1 : i32, i32, i32
  }
  func.func @transform_4(%arg0: i32) -> (i32, i32, i32) {
    %c0_i32 = arith.constant 0 : i32
    %c0_i32_0 = arith.constant 0 : i32
    %c0_i32_1 = arith.constant 0 : i32
    %c0_i32_2 = arith.constant 0 : i32
    return %c0_i32, %c0_i32_0, %c0_i32_1 : i32, i32, i32
  }
}

</mosaic_0001>

<bundles_post_ra>
// kernel: tpu_custom_call.1
= control target key start
LH: loop header
LB: loop body
LE: loop exit
PB: predicated region body
PF: predicated region fallthrough
CT: control target
= control target key end

     0   :  { %10 = vsyncpa [#allocation3], 0  ;;  %v160_v1 = vmov 0   ;;  %s211_s0 = inlined_call_operand.vmem [shape: f32[2,8,1], index: 0, kind: input, shape index: {}]   ;;  %s212_s1 = inlined_call_operand.vmem [shape: f32[8,128], index: 1, kind: input, shape index: {}]   ;;  %s213_s2 = inlined_call_operand.vmem [shape: f32[8,128], index: 2, kind: input, shape index: {}]   ;;  %s214_s3 = inlined_call_operand.hbm [shape: f32[2,8,128], index: 3, kind: output, shape index: {0}]   ;;  %s215_s4 = inlined_call_operand.hbm [shape: f32[2,1,128], index: 4, kind: output, shape index: {1}]  }
   0x1   :  { %v18_v0 = vld [vmem:[%s211_s0] sm:$0xff]  ;;  %105 = vset.pattern.permute.xlu0 %v160_v1 }
   0x2   :  { %11 = vsyncpa [#allocation5], 0  ;;  %24 = vperm.xlu0 %105, %v18_v0   ;;  %v19_v2 = vld [vmem:[%s211_s0 + $0x8] sm:$0xff]  ;;  %v161_v3 = vmov 8.0   ;;  %v20_v5 = vld [vmem:[%s212_s1] sm:$0xff]  ;;  %s162_s0 = smov [#allocation2]  }
   0x3   :  { %106 = vrcp.f32 %v161_v3  ;;  %v21_v7 = vld [vmem:[%s213_s2] sm:$0xff]  ;;  %s65_s23 = sshll.u32 %s162_s0, 4  ;;  %s67_s26 = sshll.u32 %s214_s3, 4  ;;  %s66_s23 = int_to_ptr.vmem [resolvable:$true] %s65_s23  ;;  %s68_s26 = int_to_ptr.hbm [resolvable:$true] %s67_s26 }
   0x4   :  { %s163_s1 = smov 128   ;;  %s164_s2 = smov 8  }
   0x5   :  { %s165_s3 = smov [#allocation4]   ;;  %s80_s30 = sshll.u32 %s215_s4, 4  ;;  %s81_s30 = int_to_ptr.hbm [resolvable:$true] %s80_s30 }
   0x6   :  { %s78_s27 = sshll.u32 %s165_s3, 4  ;;  %s166_s5 = smov 16   ;;  %s79_s27 = int_to_ptr.vmem [resolvable:$true] %s78_s27 }
   0x7   :  { %s167_s6 = smov 1  }
   0x9   :  { %v107_v4 = vpop.eup %106 }
   0xa   :  { %29 = vperm.xlu0 %105, %v19_v2   ;;  %v49_v6 = vmul.f32 8.0, %v107_v4  ;;  %vm53_vm0 = vweird.f32 %v107_v4 }
   0xc   :  { %v50_v10 = vsub.f32 1.0, %v49_v6 }
   0xe   :  { %v51_v13 = vmul.f32 %v107_v4, %v50_v10 }
  0x10   :  { %v52_v18 = vadd.f32 %v107_v4, %v51_v13 }
  0x12   :  { %v54_v23 = vsel %vm53_vm0, %v107_v4, %v52_v18 }
  0x74   :  { %v25_v8 = vpop.permute.xlu0 %24 }
  0x75   :  { %v32_v9 = vmul.f32 %v25_v8, %v20_v5 }
  0x77   :  { %v34_v11 = vadd.f32 %v32_v9, %v21_v7 }
  0x79   :  { %v36_v12 = vrot.slane %v34_v11, 4  ;;  %57 = vst [vmem:[#allocation2] sm:$0xff] %v34_v11 }
  0x7b   :  { %v37_v14 = vadd.f32 %v36_v12, %v34_v11 }
  0x7c   :  { %v30_v15 = vpop.permute.xlu0 %29 }
  0x7d   :  { %v38_v16 = vrot.slane %v37_v14, 2  ;;  %v33_v17 = vmul.f32 %v30_v15, %v20_v5 }
  0x7f   :  { %v39_v19 = vadd.f32 %v38_v16, %v37_v14  ;;  %v35_v20 = vadd.f32 %v33_v17, %v21_v7 }
  0x81   :  { %v40_v21 = vrot.slane %v39_v19, 1  ;;  %v42_v22 = vrot.slane %v35_v20, 4  ;;  %58 = vst [vmem:[#allocation2 + $0x8] sm:$0xff] %v35_v20 }
  0x82   :  { %73 = dma.vmem_to_hbm [thread:$0]  %s66_s23, 256, %s68_s26, [#allocation3], %s163_s1, %s163_s1, %s164_s2  }
  0x83   :  { %v41_v24 = vadd.f32 %v40_v21, %v39_v19  ;;  %v43_v25 = vadd.f32 %v42_v22, %v35_v20 }
  0x85   :  { %v44_v26 = vrot.slane %v43_v25, 2  ;;  %v55_v27 = vmul.f32 %v54_v23, %v41_v24 }
  0x87   :  { %v45_v28 = vadd.f32 %v44_v26, %v43_v25  ;;  %59 = vst [vmem:[#allocation4] sm:$0x1] %v55_v27 }
  0x89   :  { %v46_v29 = vrot.slane %v45_v28, 1 }
  0x8b   :  { %v47_v30 = vadd.f32 %v46_v29, %v45_v28 }
  0x8d   :  { %v56_v31 = vmul.f32 %v54_v23, %v47_v30 }
  0x8f   :  { %60 = vst [vmem:[#allocation4 + $0x1] sm:$0x1] %v56_v31 }
  0x90   :  { %86 = dma.vmem_to_hbm [thread:$0]  %s79_s27, 32, %s81_s30, [#allocation5], %s166_s5, %s166_s5, %s167_s6  }
  0x91   :  { %156 = dma.done.wait [#allocation3], 256  }
  0x92   :  { %157 = vsyncadd [#allocation3], 4294967040 }
  0x93   :  { %158 = dma.done.wait [#allocation5], 32  }
  0x94   :  { %159 = vsyncadd [#allocation5], 4294967264 }
  0x95   :  { %95 = vsyncpa [#allocation3], 1 }
  0x96   :  { %96 = vsyncpa [#allocation5], 1 }

</bundles_post_ra>
